<compile_context>
chip_gen: v7x
topology: tpu7x:2x2x1
jax: 0.10.0
libtpu: 0.0.40
codegen_flags: <defaults>
</compile_context>

<pallas_src>
import jax
import jax.numpy as jnp
from jax.experimental import pallas as pl
from jax.experimental.pallas import tpu as pltpu


def _mlp2_kernel(x_ref, w1t_ref, b1_ref, w2t_ref, b2_ref, o_ref):
    # x_ref  : (block_b, F)  f32   -- natural layout, batch on sublanes
    # w1t_ref: (F, H1) f32, b1_ref: (1, H1) f32
    # w2t_ref: (H1, H2) f32, b2_ref: (1, H2) f32
    # o_ref  : (block_b, H2)
    x = x_ref[...]
    h = jnp.dot(x, w1t_ref[...], preferred_element_type=jnp.float32)
    h = jnp.tanh(h + b1_ref[...])                      # EUP tanh, sublane bcast bias
    y = jnp.dot(h, w2t_ref[...], preferred_element_type=jnp.float32)
    o_ref[...] = jnp.tanh(y + b2_ref[...]).astype(o_ref.dtype)


def _pick_block_b(batch):
    # Small batches: a single full-extent tile (one grid step, zero padding).
    if batch <= 256:
        return batch
    # Otherwise prefer the biggest sublane-aligned tile that still gives >= 2
    # grid steps (DMA/compute pipelining + v7x megacore sharding), ideally an
    # exact divisor of B so no padded boundary block is needed.
    for cand in (2048, 1024, 512, 256, 128):
        if batch % cand == 0 and batch // cand >= 2:
            return cand
    for cand in (2048, 1024, 512, 256, 128):
        if batch > cand:
            return cand            # cdiv grid; last block is padded
    return batch


def single_mlp_extractor(features, w1, b1, w2, b2, *, block_b=None, out_dtype=None):
    """latent_pi = tanh(tanh(features @ w1.T + b1) @ w2.T + b2).

    features: (B, F). w1: (H1, F), b1: (H1,), w2: (H2, H1), b2: (H2,)
    (torch nn.Linear layout). Returns (B, H2).
    """
    B, F = features.shape
    H1, F_ = w1.shape
    H2, H1_ = w2.shape
    assert F_ == F and H1_ == H1
    if out_dtype is None:
        out_dtype = features.dtype
    if block_b is None:
        block_b = _pick_block_b(B)

    # Tiny constant-sized parameter reshapes/transposes (KiB-scale, negligible).
    w1t = w1.T.astype(jnp.float32)                # (F, H1)
    w2t = w2.T.astype(jnp.float32)                # (H1, H2)
    b1r = b1.reshape(1, H1).astype(jnp.float32)
    b2r = b2.reshape(1, H2).astype(jnp.float32)

    grid = (pl.cdiv(B, block_b),)

    return pl.pallas_call(
        _mlp2_kernel,
        out_shape=jax.ShapeDtypeStruct((B, H2), out_dtype),
        grid_spec=pltpu.PrefetchScalarGridSpec(
            num_scalar_prefetch=0,
            grid=grid,
            in_specs=[
                pl.BlockSpec((block_b, F), lambda i: (i, 0)),   # activations tile
                pl.BlockSpec((F, H1), lambda i: (0, 0)),        # grid-invariant params
                pl.BlockSpec((1, H1), lambda i: (0, 0)),
                pl.BlockSpec((H1, H2), lambda i: (0, 0)),
                pl.BlockSpec((1, H2), lambda i: (0, 0)),
            ],
            out_specs=pl.BlockSpec((block_b, H2), lambda i: (i, 0)),
        ),
        compiler_params=pltpu.CompilerParams(
            dimension_semantics=("parallel",)),
    )(features.astype(jnp.float32), w1t, b1r, w2t, b2r)


def _torch_linear_init(key, fan_in, fan_out):
    # Deterministic stand-in for torch's default Linear init:
    # U(-1/sqrt(fan_in), 1/sqrt(fan_in)) for both W and b, W stored (out, in).
    kw, kb = jax.random.split(key)
    bound = 1.0 / jnp.sqrt(jnp.float32(fan_in))
    w = jax.random.uniform(kw, (fan_out, fan_in), jnp.float32, -bound, bound)
    b = jax.random.uniform(kb, (fan_out,), jnp.float32, -bound, bound)
    return w, b


def reference_mlp(features, w1, b1, w2, b2):
    h = jnp.tanh(features @ w1.T + b1)
    return jnp.tanh(h @ w2.T + b2)


if __name__ == "__main__":
    # Config: feature_dim=16, net_arch=[dict(pi=[32, 32])], activation=Tanh.
    feature_dim, h1, h2 = 16, 32, 32

    key = jax.random.PRNGKey(0)
    k_x, k_l1, k_l2 = jax.random.split(key, 3)
    w1, b1 = _torch_linear_init(k_l1, feature_dim, h1)
    w2, b2 = _torch_linear_init(k_l2, h1, h2)

    # Exercise both paths: tiny single-tile batch and a multi-step tiled batch
    # (block_b=128, grid=(3,), 'parallel' -> pipelined / megacore-shardable).
    for batch in (8, 384):
        features = jax.random.normal(k_x, (batch, feature_dim), jnp.float32)

        latent_pi = single_mlp_extractor(features, w1, b1, w2, b2)
        latent_pi = jax.block_until_ready(latent_pi)

        ref = reference_mlp(features, w1, b1, w2, b2)
        assert latent_pi.shape == (batch, h2)
        err = float(jnp.max(jnp.abs(latent_pi - ref)))
        # Loose tolerance guards against MXU default-precision matmul paths.
        assert jnp.allclose(latent_pi, ref, atol=2e-2, rtol=2e-2), err

    print("KERNEL_OK")
</pallas_src>

<mosaic_0001>
module attributes {stable_mosaic.version = 11 : i64} {
  func.func @_mlp2_kernel(%arg0: i32, %arg1: memref<8x16xf32, #tpu.memory_space<vmem>>, %arg2: memref<16x32xf32, #tpu.memory_space<vmem>>, %arg3: memref<1x32xf32, #tpu.memory_space<vmem>>, %arg4: memref<32x32xf32, #tpu.memory_space<vmem>>, %arg5: memref<1x32xf32, #tpu.memory_space<vmem>>, %arg6: memref<8x32xf32, #tpu.memory_space<vmem>>) attributes {dimension_semantics = [#tpu.dimension_semantics<parallel>], iteration_bounds = array<i64: 1>, scalar_prefetch = 0 : i64, scratch_operands = 0 : i64, tpu.core_type = #tpu.core_type<tc>, window_params = [{transform_indices = @transform_0, window_bounds = array<i64: 8, 16>}, {pipeline_mode = #tpu.pipeline_mode<synchronous>, transform_indices = @transform_1, window_bounds = array<i64: 16, 32>}, {pipeline_mode = #tpu.pipeline_mode<synchronous>, transform_indices = @transform_2, window_bounds = array<i64: 1, 32>}, {pipeline_mode = #tpu.pipeline_mode<synchronous>, transform_indices = @transform_3, window_bounds = array<i64: 32, 32>}, {pipeline_mode = #tpu.pipeline_mode<synchronous>, transform_indices = @transform_4, window_bounds = array<i64: 1, 32>}, {transform_indices = @transform_5, window_bounds = array<i64: 8, 32>}]} {
    %c0 = arith.constant 0 : index
    %c0_0 = arith.constant 0 : index
    %0 = vector.load %arg1[%c0, %c0_0] : memref<8x16xf32, #tpu.memory_space<vmem>>, vector<8x16xf32>
    %c0_1 = arith.constant 0 : index
    %c0_2 = arith.constant 0 : index
    %1 = vector.load %arg2[%c0_1, %c0_2] : memref<16x32xf32, #tpu.memory_space<vmem>>, vector<16x32xf32>
    %cst = arith.constant dense<0.000000e+00> : vector<8x32xf32>
    %2 = tpu.matmul %0, %1, %cst {dimension_numbers = #tpu.dot_dimension_numbers<[1], [0], [0], [1], [0, 0, 1, 1], [], []>} : vector<8x16xf32>, vector<16x32xf32>, vector<8x32xf32> -> vector<8x32xf32>
    %c0_3 = arith.constant 0 : index
    %c0_4 = arith.constant 0 : index
    %3 = vector.load %arg3[%c0_3, %c0_4] : memref<1x32xf32, #tpu.memory_space<vmem>>, vector<1x32xf32>
    %4 = vector.broadcast %3 : vector<1x32xf32> to vector<8x32xf32>
    %5 = arith.addf %2, %4 : vector<8x32xf32>
    %6 = math.tanh %5 : vector<8x32xf32>
    %c0_5 = arith.constant 0 : index
    %c0_6 = arith.constant 0 : index
    %7 = vector.load %arg4[%c0_5, %c0_6] : memref<32x32xf32, #tpu.memory_space<vmem>>, vector<32x32xf32>
    %cst_7 = arith.constant dense<0.000000e+00> : vector<8x32xf32>
    %8 = tpu.matmul %6, %7, %cst_7 {dimension_numbers = #tpu.dot_dimension_numbers<[1], [0], [0], [1], [0, 0, 1, 1], [], []>} : vector<8x32xf32>, vector<32x32xf32>, vector<8x32xf32> -> vector<8x32xf32>
    %c0_8 = arith.constant 0 : index
    %c0_9 = arith.constant 0 : index
    %9 = vector.load %arg5[%c0_8, %c0_9] : memref<1x32xf32, #tpu.memory_space<vmem>>, vector<1x32xf32>
    %10 = vector.broadcast %9 : vector<1x32xf32> to vector<8x32xf32>
    %11 = arith.addf %8, %10 : vector<8x32xf32>
    %12 = math.tanh %11 : vector<8x32xf32>
    %c0_10 = arith.constant 0 : index
    %c0_11 = arith.constant 0 : index
    %13 = vector.load %arg6[%c0_10, %c0_11] : memref<8x32xf32, #tpu.memory_space<vmem>>, vector<8x32xf32>
    tpu.vector_store %arg6[%c0_10, %c0_11], %12 {strides = array<i32>} : memref<8x32xf32, #tpu.memory_space<vmem>>, vector<8x32xf32>,
    return
  }
  func.func @transform_0(%arg0: i32) -> (i32, i32) {
    %c0_i32 = arith.constant 0 : i32
    %c0_i32_0 = arith.constant 0 : i32
    return %arg0, %c0_i32 : i32, i32
  }
  func.func @transform_1(%arg0: i32) -> (i32, i32) {
    %c0_i32 = arith.constant 0 : i32
    %c0_i32_0 = arith.constant 0 : i32
    %c0_i32_1 = arith.constant 0 : i32
    return %c0_i32, %c0_i32_0 : i32, i32
  }
  func.func @transform_2(%arg0: i32) -> (i32, i32) {
    %c0_i32 = arith.constant 0 : i32
    %c0_i32_0 = arith.constant 0 : i32
    %c0_i32_1 = arith.constant 0 : i32
    return %c0_i32, %c0_i32_0 : i32, i32
  }
  func.func @transform_3(%arg0: i32) -> (i32, i32) {
    %c0_i32 = arith.constant 0 : i32
    %c0_i32_0 = arith.constant 0 : i32
    %c0_i32_1 = arith.constant 0 : i32
    return %c0_i32, %c0_i32_0 : i32, i32
  }
  func.func @transform_4(%arg0: i32) -> (i32, i32) {
    %c0_i32 = arith.constant 0 : i32
    %c0_i32_0 = arith.constant 0 : i32
    %c0_i32_1 = arith.constant 0 : i32
    return %c0_i32, %c0_i32_0 : i32, i32
  }
  func.func @transform_5(%arg0: i32) -> (i32, i32) {
    %c0_i32 = arith.constant 0 : i32
    %c0_i32_0 = arith.constant 0 : i32
    return %arg0, %c0_i32 : i32, i32
  }
}

</mosaic_0001>

<bundles_post_ra>
// kernel: tpu_custom_call.1
= control target key start
LH: loop header
LB: loop body
LE: loop exit
PB: predicated region body
PF: predicated region fallthrough
CT: control target
= control target key end

     0   :  { %10 = vsyncpa [#allocation3], 0  ;;  %s493_s0 = inlined_call_operand.hbm [shape: f32[8,16], index: 0, kind: input, shape index: {}]   ;;  %s494_s1 = inlined_call_operand.hbm [shape: f32[16,32], index: 1, kind: input, shape index: {}]   ;;  %s495_s2 = inlined_call_operand.vmem [shape: f32[1,32], index: 2, kind: input, shape index: {}]   ;;  %s496_s3 = inlined_call_operand.hbm [shape: f32[32,32], index: 3, kind: input, shape index: {}]   ;;  %s497_s4 = inlined_call_operand.vmem [shape: f32[1,32], index: 4, kind: input, shape index: {}]   ;;  %s498_s5 = inlined_call_operand.hbm [shape: f32[8,32], index: 5, kind: output, shape index: {}]  }
   0x1   :  { %11 = vsyncpa [#allocation6], 0 }
   0x2   :  { %12 = vsyncpa [#allocation4], 0  ;;  %s394_s18 = smov [#allocation5]   ;;  %s300_s22 = scalar_lea.hbm %s494_s1, 256 }
   0x3   :  { %s28_s19 = sshll.u32 %s394_s18, 4  ;;  %p301_p0 = scmp.ne.s32.totalorder %s494_s1, %s300_s22  ;;  %s29_s19 = int_to_ptr.vmem [resolvable:$true] %s28_s19 }
   0x4   :  { %p304_p1 = scmp.lt.u32.totalorder %s300_s22, %s494_s1 }
   0x6   :  { %p306_p2 = pnand %p304_p1, %p301_p0 }
   0x8   :  { %309 = shalt.err (!%p306_p2)
}
   0x9   :  { %s310_s27 = scalar_lea.vmem %s29_s19, 256  ;;  %p315_p4 = scmp.lt.s32.totalorder %s29_s19, %s29_s19 }
   0xa   :  { %p311_p3 = scmp.ne.s32.totalorder %s29_s19, %s310_s27  ;;  %p316_p5 = scmp.lt.s32.totalorder %s310_s27, %s310_s27 }
   0xc   :  { %p317_p6 = por %p316_p5, %p315_p4 }
   0xe   :  { %p318_p7 = pnand %p317_p6, %p311_p3 }
  0x10   :  { %321 = shalt.err (!%p318_p7)
}
  0x11   :  { %s395_s28 = smov 128   ;;  %s396_s29 = smov 8  }
  0x12   :  { %34 = dma.hbm_to_vmem [thread:$0]  %s494_s1, 256, %s29_s19, [#allocation6], %s395_s28, %s395_s28, %s396_s29  }
  0x13   :  { %s397_s7 = smov [#allocation2]   ;;  %s398_s9 = smov [#allocation7]  }
  0x14   :  { %s19_s8 = sshll.u32 %s397_s7, 4  ;;  %s42_s10 = sshll.u32 %s398_s9, 4  ;;  %s20_s8 = int_to_ptr.vmem [resolvable:$true] %s19_s8  ;;  %s43_s10 = int_to_ptr.vmem [resolvable:$true] %s42_s10 }
  0x15   :  { %s322_s13 = scalar_lea.hbm %s493_s0, 128 }
  0x16   :  { %p323_p8 = scmp.ne.s32.totalorder %s493_s0, %s322_s13  ;;  %p326_p9 = scmp.lt.u32.totalorder %s322_s13, %s493_s0 }
  0x18   :  { %p328_p10 = pnand %p326_p9, %p323_p8 }
  0x1a   :  { %331 = shalt.err (!%p328_p10)
}
  0x1b   :  { %s332_s1 = scalar_lea.vmem %s20_s8, 128  ;;  %p337_p12 = scmp.lt.s32.totalorder %s20_s8, %s20_s8 }
  0x1c   :  { %p333_p11 = scmp.ne.s32.totalorder %s20_s8, %s332_s1  ;;  %p338_p13 = scmp.lt.s32.totalorder %s332_s1, %s332_s1 }
  0x1e   :  { %p339_p0 = por %p338_p13, %p337_p12 }
  0x20   :  { %p340_p1 = pnand %p339_p0, %p333_p11 }
  0x22   :  { %343 = shalt.err (!%p340_p1)
}
  0x23   :  { %22 = dma.hbm_to_vmem [thread:$0]  %s493_s0, 128, %s20_s8, [#allocation3]  }
  0x24   :  { %s344_s22 = scalar_lea.hbm %s496_s3, 512 }
  0x25   :  { %p345_p2 = scmp.ne.s32.totalorder %s496_s3, %s344_s22  ;;  %p348_p3 = scmp.lt.u32.totalorder %s344_s22, %s496_s3 }
  0x27   :  { %p350_p4 = pnand %p348_p3, %p345_p2 }
  0x29   :  { %353 = shalt.err (!%p350_p4)
}
  0x2a   :  { %s354_s27 = scalar_lea.vmem %s43_s10, 512  ;;  %p359_p6 = scmp.lt.s32.totalorder %s43_s10, %s43_s10 }
  0x2b   :  { %p355_p5 = scmp.ne.s32.totalorder %s43_s10, %s354_s27  ;;  %p360_p7 = scmp.lt.s32.totalorder %s354_s27, %s354_s27 }
  0x2d   :  { %p361_p8 = por %p360_p7, %p359_p6 }
  0x2f   :  { %p362_p9 = pnand %p361_p8, %p355_p5 }
  0x31   :  { %365 = shalt.err (!%p362_p9)
}
  0x32   :  { %48 = dma.hbm_to_vmem [thread:$0]  %s496_s3, 512, %s43_s10, [#allocation6], %s395_s28, %s395_s28, %s396_s29  }
  0x33   :  { %388 = dma.done.wait [#allocation3], 128  }
  0x34   :  { %389 = vsyncadd [#allocation3], 4294967168 }
  0x35   :  { %390 = dma.done.wait [#allocation6], 768  }
  0x36   :  { %391 = vsyncadd [#allocation6], 4294966528  ;;  %v399_v0 = vmov 0.0|0.0   ;;  %vm400_vm0 = vmmov 0   ;;  %v401_v1 = vmov 0.0   ;;  %v61_v2 = vld [vmem:[#allocation5] sm:$0xff] }
  0x37   :  { %278 = vmatprep.subr.bf16.mxu0 %v399_v0  ;;  %264 = vmatprep.mubr.msk.f32.mxu0 %vm400_vm0, %v401_v1  ;;  %v62_v3 = vld [vmem:[#allocation5 + $0x8] sm:$0xff]  ;;  %v60_v5 = vld [vmem:[#allocation2] sm:$0xff]  ;;  %vm70_vm1 = vcmask 130048   ;;  %v145_v6 = vld [vmem:[#allocation7] sm:$0xff]  ;;  %vm156_vm2 = vcmask 261120   ;;  %s402_s7 = smov [#allocation8]  }
  0x38   :  { %281 = vmatprep.subr.bf16.mxu1 %v399_v0  ;;  %275 = vmatprep.mubr.msk.f32.mxu1 %vm400_vm0, %v401_v1  ;;  %v279_v4 = vpack.c.bf16 %v62_v3, %v61_v2  ;;  %v146_v7 = vld [vmem:[#allocation7 + $0x8] sm:$0xff]  ;;  %v147_v8 = vld [vmem:[#allocation7 + $0x10] sm:$0xff]  ;;  %v148_v10 = vld [vmem:[#allocation7 + $0x18] sm:$0xff]  ;;  %s238_s8 = sshll.u32 %s402_s7, 4  ;;  %s239_s8 = int_to_ptr.vmem [resolvable:$true] %s238_s8 }
  0x39   :  { %v282_v9 = vpack.c.bf16 %v146_v7, %v145_v6  ;;  %v285_v11 = vpack.c.bf16 %v148_v10, %v147_v8  ;;  %v248_v12 = vld [vmem:[%s495_s2] ss:$0 sm:$0xff]  ;;  %s366_s2 = scalar_lea.vmem %s239_s8, 128  ;;  %p371_p11 = scmp.lt.s32.totalorder %s239_s8, %s239_s8 }
  0x3a   :  { %280 = vmatpush3.bf16.msra.mxu0 %v279_v4  ;;  %v250_v17 = vld [vmem:[%s497_s4] ss:$0 sm:$0xff]  ;;  %p367_p10 = scmp.ne.s32.totalorder %s239_s8, %s366_s2  ;;  %p372_p12 = scmp.lt.s32.totalorder %s366_s2, %s366_s2 }
  0x3b   :  { %283 = vmatpush3.bf16.msra.mxu1 %v282_v9 }
  0x3c   :  { %284 = vmatprep.subr.bf16.mxu1 %v399_v0  ;;  %p373_p13 = por %p372_p12, %p371_p11 }
  0x3d   :  { %265 = vmatmul.mubr.msk.f32.vlgmr.msra.gmra.mrb[0].mxu0 %vm70_vm1, %v60_v5 }
  0x3e   :  { %p374_p0 = pnand %p373_p13, %p367_p10 }
  0x3f   :  { %286 = vmatpush3.bf16.msra.mxu1 %v285_v11 }
 0x110   :  { %v140_v13 = vpop.f32.mrb[0].mxu0 }
 0x111   :  { %v141_v14 = vadd.f32 %v248_v12, %v140_v13  ;;  %v266_v15 = vpop.f32.mrb[1].mxu0 }
 0x113   :  { %296 = vtanh.f32 %v141_v14 }
 0x11d   :  { %v297_v16 = vpop.eup %296 }
 0x11e   :  { %276 = vmatmul.mubr.msk.f32.vlgmr.msra.gmra.mrb[0].mxu1 %vm156_vm2, %v297_v16 }
 0x1f1   :  { %v226_v18 = vpop.f32.mrb[0].mxu1 }
 0x1f2   :  { %v227_v19 = vadd.f32 %v250_v17, %v226_v18  ;;  %v277_v20 = vpop.f32.mrb[1].mxu1 }
 0x1f4   :  { %298 = vtanh.f32 %v227_v19 }
 0x1fe   :  { %v299_v21 = vpop.eup %298 }
 0x1ff   :  { %231 = vst.msk [vmem:[#allocation8] sm:$0xff] %vm156_vm2, %v299_v21 }
 0x200   :  { %377 = shalt.err (!%p374_p0)
}
 0x201   :  { %s378_s4 = scalar_lea.hbm %s498_s5, 128 }
 0x202   :  { %p379_p1 = scmp.ne.s32.totalorder %s498_s5, %s378_s4  ;;  %p382_p2 = scmp.lt.u32.totalorder %s378_s4, %s498_s5 }
 0x204   :  { %p384_p3 = pnand %p382_p2, %p379_p1 }
 0x206   :  { %387 = shalt.err (!%p384_p3)
}
 0x207   :  { %241 = dma.vmem_to_hbm [thread:$0]  %s239_s8, 128, %s498_s5, [#allocation4]  }
 0x208   :  { %392 = dma.done.wait [#allocation4], 128  }
 0x209   :  { %393 = vsyncadd [#allocation4], 4294967168 }
 0x20a   :  { %245 = vsyncpa [#allocation3], 1 }
 0x20b   :  { %246 = vsyncpa [#allocation6], 1 }
 0x20c   :  { %247 = vsyncpa [#allocation4], 1 }

</bundles_post_ra>
